<compile_context>
chip_gen: v5e
topology: v5e:2x2
jax: 0.10.0
libtpu: 0.0.40
codegen_flags: <defaults>
</compile_context>

<pallas_src>
import jax
import jax.numpy as jnp
from jax.experimental import pallas as pl
from jax.experimental.pallas import tpu as pltpu


_LANE = 512                 # lane-dense last dim (large multiple of 128 -> unmasked vst)
_TM_MAX = 1024              # rows per tile: (1024, 512) f32 = 2 MiB per block
_MIN_KERNEL_ELEMS = _LANE * 8   # below this, XLA's fused elementwise op wins


def linear_kernel(w_ref, b_ref, x_ref, o_ref):
    # nn.Linear(1, 1): with in == out == 1 the matmul degenerates to a scalar
    # FMA, done on the VPU over the whole lane-dense (TM, LANE) tile.
    # (Deliberately NOT routed through the MXU / jnp.dot.)
    o_ref[...] = x_ref[...] * w_ref[0] + b_ref[0]


def linear_fc(x, w, b, *, tm=_TM_MAX):
    """x: (..., 1) f32, w: (1, 1) f32, b: (1,) f32 -> same shape as x."""
    orig_shape = x.shape
    total = x.size
    w_s = w.reshape(1)
    b_s = b.reshape(1)

    # Tiny inputs: the kernel would be 100% launch/DMA overhead; plain JAX.
    if total < _MIN_KERNEL_ELEMS:
        return x * w_s[0] + b_s[0]

    # --- reshape to a lane-dense slab, padded to a whole number of tiles ---
    m = pl.cdiv(total, _LANE)
    tm = min(tm, m)
    if tm < m:
        tm = max(8, (tm // 8) * 8)          # sublane-aligned when not full-dim
    m_pad = pl.cdiv(m, tm) * tm
    padded_len = m_pad * _LANE

    flat = jnp.pad(x.reshape(-1), (0, padded_len - total))
    x2 = flat.reshape(m_pad, _LANE)

    grid = (m_pad // tm,)
    out2 = pl.pallas_call(
        linear_kernel,
        out_shape=jax.ShapeDtypeStruct((m_pad, _LANE), x.dtype),
        grid=grid,
        in_specs=[
            pl.BlockSpec(memory_space=pltpu.SMEM),       # weight scalar (1,)
            pl.BlockSpec(memory_space=pltpu.SMEM),       # bias   scalar (1,)
            pl.BlockSpec((tm, _LANE), lambda i: (i, 0)),  # x tile (double-buffered)
        ],
        out_specs=pl.BlockSpec((tm, _LANE), lambda i: (i, 0)),
        compiler_params=pltpu.CompilerParams(
            # 1-D grid of independent row-tiles: shard across TCs on v7x,
            # harmless on single-TC v5e/v6e.
            dimension_semantics=("parallel",),
        ),
    )(w_s, b_s, x2)

    # Drop padded rows and restore the caller's layout.
    return out2.reshape(-1)[:total].reshape(orig_shape)


if __name__ == "__main__":
    key = jax.random.PRNGKey(0)

    # Module params exactly as in __init__: constant-zero weight & bias.
    w = jnp.zeros((1, 1), dtype=jnp.float32)
    b = jnp.zeros((1,), dtype=jnp.float32)

    # Small batch of scalars through nn.Linear(1, 1).
    N = 8192
    x = jax.random.normal(key, (N, 1), dtype=jnp.float32)

    # tm=8 keeps the test small while still exercising the tiled (grid > 1) path.
    out = jax.block_until_ready(linear_fc(x, w, b, tm=8))
    ref = x @ w.T + b
    assert out.shape == (N, 1)
    assert jnp.allclose(out, ref, atol=1e-6)

    # Extra numerical check of the same kernel with non-zero params (default tiling).
    k1, k2, k3 = jax.random.split(key, 3)
    w2 = jax.random.normal(k1, (1, 1), dtype=jnp.float32)
    b2 = jax.random.normal(k2, (1,), dtype=jnp.float32)
    out2 = jax.block_until_ready(linear_fc(x, w2, b2))
    assert jnp.allclose(out2, x @ w2.T + b2, atol=1e-5)

    # Tiny-N fast path (below the kernel threshold -> plain JAX).
    x_small = jax.random.normal(k3, (8, 1), dtype=jnp.float32)
    out3 = jax.block_until_ready(linear_fc(x_small, w2, b2))
    assert jnp.allclose(out3, x_small @ w2.T + b2, atol=1e-5)

    print("KERNEL_OK")
</pallas_src>

<mosaic_0001>
module attributes {stable_mosaic.version = 11 : i64} {
  func.func @linear_kernel(%arg0: i32, %arg1: memref<1xf32, #tpu.memory_space<smem>>, %arg2: memref<1xf32, #tpu.memory_space<smem>>, %arg3: memref<8x512xf32, #tpu.memory_space<vmem>>, %arg4: memref<8x512xf32, #tpu.memory_space<vmem>>) attributes {dimension_semantics = [#tpu.dimension_semantics<parallel>], iteration_bounds = array<i64: 2>, scalar_prefetch = 0 : i64, scratch_operands = 0 : i64, tpu.core_type = #tpu.core_type<tc>, window_params = [{transform_indices = @transform_0, window_bounds = array<i64: 1>}, {transform_indices = @transform_1, window_bounds = array<i64: 1>}, {transform_indices = @transform_2, window_bounds = array<i64: 8, 512>}, {transform_indices = @transform_3, window_bounds = array<i64: 8, 512>}]} {
    %c0 = arith.constant 0 : index
    %c0_0 = arith.constant 0 : index
    %0 = vector.load %arg3[%c0, %c0_0] : memref<8x512xf32, #tpu.memory_space<vmem>>, vector<8x512xf32>
    %c0_1 = arith.constant 0 : index
    %1 = memref.load %arg1[%c0_1] : memref<1xf32, #tpu.memory_space<smem>>
    %2 = vector.broadcast %1 : f32 to vector<8x512xf32>
    %3 = arith.mulf %0, %2 : vector<8x512xf32>
    %c0_2 = arith.constant 0 : index
    %4 = memref.load %arg2[%c0_2] : memref<1xf32, #tpu.memory_space<smem>>
    %5 = vector.broadcast %4 : f32 to vector<8x512xf32>
    %6 = arith.addf %3, %5 : vector<8x512xf32>
    %c0_3 = arith.constant 0 : index
    %c0_4 = arith.constant 0 : index
    %7 = vector.load %arg4[%c0_3, %c0_4] : memref<8x512xf32, #tpu.memory_space<vmem>>, vector<8x512xf32>
    tpu.vector_store %arg4[%c0_3, %c0_4], %6 {strides = array<i32>} : memref<8x512xf32, #tpu.memory_space<vmem>>, vector<8x512xf32>,
    return
  }
  func.func @transform_0(%arg0: i32) -> i32 {
    %c0_i32 = arith.constant 0 : i32
    %c0_i32_0 = arith.constant 0 : i32
    return %c0_i32 : i32
  }
  func.func @transform_1(%arg0: i32) -> i32 {
    %c0_i32 = arith.constant 0 : i32
    %c0_i32_0 = arith.constant 0 : i32
    return %c0_i32 : i32
  }
  func.func @transform_2(%arg0: i32) -> (i32, i32) {
    %c0_i32 = arith.constant 0 : i32
    %c0_i32_0 = arith.constant 0 : i32
    return %arg0, %c0_i32 : i32, i32
  }
  func.func @transform_3(%arg0: i32) -> (i32, i32) {
    %c0_i32 = arith.constant 0 : i32
    %c0_i32_0 = arith.constant 0 : i32
    return %arg0, %c0_i32 : i32, i32
  }
}

</mosaic_0001>

<bundles_post_ra>
// kernel: tpu_custom_call.1
= control target key start
LH: loop header
LB: loop body
LE: loop exit
PB: predicated region body
PF: predicated region fallthrough
CT: control target
= control target key end

     0   :  { %s611_s0 = inlined_call_operand.<no memory space> [shape: f32[1], index: 0, kind: input, shape index: {}]   ;;  %s612_s1 = inlined_call_operand.<no memory space> [shape: f32[1], index: 1, kind: input, shape index: {}]   ;;  %s613_s2 = inlined_call_operand.hbm [shape: f32[16,512], index: 2, kind: input, shape index: {}]   ;;  %s614_s3 = inlined_call_operand.hbm [shape: f32[16,512], index: 3, kind: output, shape index: {}]  }
   0x1   :  { %8 = sst [smem:[#allocation2]] %s611_s0 }
   0x2   :  { %9 = sst [smem:[#allocation3]] %s612_s1 }
   0x3   :  { %10 = vsyncpa [#allocation5], 0 }
   0x4   :  { %12 = vsyncpa [#allocation5 + $0x1], 0 }
   0x5   :  { %13 = vsyncpa [#allocation6], 0 }
   0x6   :  { %15 = vsyncpa [#allocation6 + $0x1], 0  ;;  %s484_s16 = smov 0   ;;  %s486_s17 = smov 0  }
   0x7   :  { %s488_s18 = smov 0   ;;  %s490_s19 = smov 0  }
   0x8 LB: > { %s505_s0 = sadd.s32 4294967295, %s456_s19   ;;  %s298_s1 = sadd.s32 4294967294, %s456_s19   ;;  %s456_s19 = sphi %s490_s19, %s624_s19   ;;  %s452_s18 = sphi %s488_s18, %s623_s18   ;;  %s448_s17 = sphi %s486_s17, %s622_s17   ;;  %s444_s16 = sphi %s484_s16, %s621_s16  }
   0x9   : > { %s509_s20 = sadd.s32 1, %s456_s19   ;;  %s70_s21 = sadd.s32 1, %s452_s18 }
   0xa   : > { %s67_s22 = ssub.s32 %s456_s19, %s509_s20  ;;  %p77_p0 = scmp.ne.s32.totalorder %s452_s18, %s448_s17 }
   0xb   : > { %p68_p1 = scmp.eq.s32.totalorder %s67_s22, 0  ;;  %p78_p2 = scmp.eq.s32.totalorder %s456_s19, 0 }
   0xc   : > { %p83_p3 = scmp.ne.s32.totalorder %s448_s17, %s444_s16  ;;  %p84_p4 = scmp.eq.s32.totalorder %s505_s0, 0 }
   0xd   : > { %s521_s23 = scalar_select %p68_p1, %s452_s18, %s70_s21  }
   0xe   : > { %p523_p5 = por %p78_p2, %p77_p0  ;;  %p527_p6 = por %p84_p4, %p83_p3 }
   0xf   : > { %p107_p7 = scmp.eq.s32.totalorder %s505_s0, 1  ;;  %p113_p8 = scmp.eq.s32.totalorder %s298_s1, 1 }
  0x10   : > { %p326_p10 = scmp.lt.s32.totalorder %s456_s19, 2  ;;  %s139_s28 = sand.u32 1, %s452_s18  }
  0x11   : > { %p534_p11 = por %p107_p7, %p77_p0  ;;  %p538_p12 = por %p113_p8, %p83_p3 }
  0x12   : > { %s312_s29 = sshll.u32 %s456_s19, 5  ;;  %s301_s30 = sshll.u32 %s139_s28, 5 }
  0x13   : > { %s148_s6 = scalar_lea.hbm %s613_s2, %s312_s29  ;;  %s143_s8 = scalar_lea.vmem [#allocation4], %s301_s30 }
  0x14   : > { %s150_s7 = sshll.u32 %s148_s6, 4  ;;  %s152_s9 = sshll.u32 %s143_s8, 4  ;;  %s151_s7 = int_to_ptr.hbm [resolvable:$true] %s150_s7  ;;  %s153_s9 = int_to_ptr.vmem [resolvable:$true] %s152_s9 }
  0x15   : > { %p549_p13 = pnand %p326_p10, %p523_p5  ;;  %p304_p0 = scmp.ge.s32.totalorder %s456_s19, 1 }
  0x16   : > { %p157_p1 = scmp.lt.s32.totalorder %s456_s19, 3  ;;  %s140_s11 = scalar_lea.sflag [#allocation5], %s139_s28 }
  0x17   : > { %s360_s12 = sshra.s32 %s151_s7, 4  ;;  %p364_p3 = pneg %p549_p13  ;;  %s361_s12 = int_to_ptr.hbm [resolvable:$true] %s360_s12 }
  0x18   : > { %s362_s13 = scalar_lea.hbm %s361_s12, 32  ;;  %s367_s1 = scalar_lea.hbm %s613_s2, 64 }
  0x19   : > { %p363_p2 = scmp.ne.s32.totalorder %s361_s12, %s362_s13  ;;  %p368_p5 = scmp.lt.s32.totalorder %s361_s12, %s613_s2 }
  0x1a   : > { %p369_p8 = scmp.lt.s32.totalorder %s367_s1, %s362_s13 }
  0x1b   : > { %p365_p4 = pnand %p364_p3, %p363_p2 }
  0x1c   : > { %p370_p10 = por %p369_p8, %p368_p5 }
  0x1d   : > { %p366_p7 = pneg %p365_p4 }
  0x1f   : > { %p371_p9 = pnand %p370_p10, %p366_p7 }
  0x21   : > { %374 = shalt.err (!%p371_p9)
}
  0x22   : > { %321 = dma.hbm_to_vmem [thread:$0]  (!%p549_p13), %s151_s7, 512, %s153_s9, %s140_s11  }
  0x23   : > { %p158_p2 = pnand %p304_p0, %p157_p1 }
  0x24   : > { %s570_s24 = sand.u32 (!%p158_p2), 1, %s448_s17  }
  0x25   : > { %161 = sbr.rel (%p158_p2) target bundleno = 60 (0x3c), region = 32  ;;  %s305_s28 = sshll.u32 (!%p158_p2), %s570_s24, 5 }
  0x26   : > { %s164_s29 = scalar_lea.sflag (!%p158_p2), [#allocation5], %s570_s24  ;;  %s167_s30 = scalar_lea.vmem (!%p158_p2), [#allocation4], %s305_s28 }
  0x2a   : > { %435 = dma.done.wait (%p527_p6), %s164_s29, 512  }
  0x2b   : > { %437 = vsyncadd (%p527_p6), %s164_s29, 4294966784  ;;  %s195_s4 = sld [smem:[#allocation2]]  ;;  %s313_s6 = sshll.u32 %s505_s0, 5  ;;  %v191_v0 = vld [vmem:[%s167_s30] sm:$0xff]  ;;  %v192_v2 = vld [vmem:[%s167_s30 + $0x8] sm:$0xff] }
  0x2c   : > { %s201_s5 = sld [smem:[#allocation3]]  ;;  %v193_v3 = vld [vmem:[%s167_s30 + $0x10] sm:$0xff]  ;;  %s223_s9 = scalar_lea.hbm %s614_s3, %s313_s6  ;;  %v194_v8 = vld [vmem:[%s167_s30 + $0x18] sm:$0xff] }
  0x2d   : > { %s190_s25 = scalar_lea.vmem [#allocation7], %s305_s28  ;;  %s227_s0 = sshll.u32 %s223_s9, 4  ;;  %s228_s0 = int_to_ptr.hbm [resolvable:$true] %s227_s0 }
  0x2e   : > { %s225_s10 = sshll.u32 %s190_s25, 4  ;;  %s212_s11 = scalar_lea.sflag [#allocation6], %s570_s24  ;;  %s226_s10 = int_to_ptr.vmem [resolvable:$true] %s225_s10 }
  0x2f   : > { %s404_s12 = sshra.s32 %s228_s0, 4  ;;  %s410_s1 = scalar_lea.hbm %s614_s3, 64  ;;  %s405_s12 = int_to_ptr.hbm [resolvable:$true] %s404_s12 }
  0x30   : > { %s406_s13 = scalar_lea.hbm %s405_s12, 32  ;;  %p411_p0 = scmp.lt.s32.totalorder %s405_s12, %s614_s3 }
  0x31   : > { %v196_v1 = vstv %s195_s4  ;;  %p407_p6 = scmp.ne.s32.totalorder %s405_s12, %s406_s13  ;;  %p412_p1 = scmp.lt.s32.totalorder %s410_s1, %s406_s13 }
  0x32   : > { %v197_v4 = vmul.f32 %v196_v1, %v191_v0  ;;  %v202_v5 = vstv %s201_s5  ;;  %v198_v6 = vmul.f32 %v196_v1, %v192_v2  ;;  %v199_v7 = vmul.f32 %v196_v1, %v193_v3 }
  0x33   : > { %v200_v9 = vmul.f32 %v196_v1, %v194_v8  ;;  %p408_p9 = pnand %p407_p6, %p534_p11  ;;  %p413_p3 = por %p412_p1, %p411_p0 }
  0x34   : > { %v203_v10 = vadd.f32 %v202_v5, %v197_v4  ;;  %v204_v11 = vadd.f32 %v202_v5, %v198_v6  ;;  %v205_v12 = vadd.f32 %v202_v5, %v199_v7 }
  0x35   : > { %v206_v13 = vadd.f32 %v202_v5, %v200_v9  ;;  %p409_p13 = pneg %p408_p9 }
  0x36   : > { %207 = vst [vmem:[%s190_s25] sm:$0xff] %v203_v10 }
  0x37   : > { %208 = vst [vmem:[%s190_s25 + $0x8] sm:$0xff] %v204_v11  ;;  %p414_p4 = pnand %p413_p3, %p409_p13 }
  0x38   : > { %209 = vst [vmem:[%s190_s25 + $0x10] sm:$0xff] %v205_v12 }
  0x39   : > { %210 = vst [vmem:[%s190_s25 + $0x18] sm:$0xff] %v206_v13 }
  0x3a   : > { %417 = shalt.err (!%p414_p4)
}
  0x3b   : > { %316 = dma.vmem_to_hbm [thread:$0]  (%p534_p11), %s226_s10, 512, %s228_s0, %s212_s11  }
  0x3c PF: > { %s239_s24 = sand.u32 1, %s444_s16   ;;  %p620_p7 = scmp.ge.s32.totalorder %s456_s19, 2 }
  0x3d   : > { %s240_s28 = scalar_lea.sflag [#allocation6], %s239_s24 }
  0x3e   : > { %p323_p5 = pnand %p620_p7, %p538_p12 }
  0x40   : > { %p324_p8 = pneg %p323_p5 }
  0x42   : > { %439 = dma.done.wait (%p324_p8), %s240_s28, 512  }
  0x43   : > { %441 = vsyncadd (%p324_p8), %s240_s28, 4294966784  ;;  %p18_p10 = scmp.ge.s32.totalorder %s509_s20, 4   ;;  %s621_s16 = smov %s448_s17 }
  0x44   : > { %s622_s17 = smov %s452_s18  ;;  %s623_s18 = smov %s521_s23 }
  0x45   : > { %s624_s19 = smov %s509_s20  ;;  %20 = sbr.rel (!%p18_p10) target bundleno = 8 (0x8), region = 77 }
  0x4a   :  { %246 = vsyncpa [#allocation5], 1 }
  0x4b   :  { %248 = vsyncpa [#allocation5 + $0x1], 1 }
  0x4c   :  { %249 = vsyncpa [#allocation6], 1 }
  0x4d   :  { %251 = vsyncpa [#allocation6 + $0x1], 1 }

</bundles_post_ra>
